<compile_context>
chip_gen: v7x
topology: tpu7x:2x2x1
jax: 0.10.0
libtpu: 0.0.40
codegen_flags: <defaults>
</compile_context>

<pallas_src>
import jax
import jax.numpy as jnp
from jax.experimental import pallas as pl
from jax.experimental.pallas import tpu as pltpu

# ---------------------------------------------------------------------------
# "Config" values (synthetic, deterministic; consistent with the module docs)
# ---------------------------------------------------------------------------
MLP_INPUT_SIZE = 588        # 3 layers * 196 patches
MLP_HIDDEN_SIZE_1 = 256
MLP_HIDDEN_SIZE_2 = 128
MLP_NUM_CONCEPTS = 10
MLP_DROPOUT = 0.3           # TODO(synk): dropout is a no-op at inference; not applied in kernel

_LANE = 128


def _round_up(x: int, m: int) -> int:
    return ((x + m - 1) // m) * m


K_PAD = _round_up(MLP_INPUT_SIZE, _LANE)      # 640
N_PAD = _round_up(MLP_NUM_CONCEPTS, _LANE)    # 128


# ---------------------------------------------------------------------------
# Pallas kernel: fused 3-layer MLP on one (TB, K_PAD) batch tile.
# Weights are bf16 (MXU-native), accumulation / bias / ReLU in f32.
# ---------------------------------------------------------------------------
def _mlp_kernel(x_ref, w1_ref, b1_ref, w2_ref, b2_ref, w3_ref, b3_ref, o_ref):
    x = x_ref[...].astype(jnp.bfloat16)

    # Layer 1: (TB, 640) @ (640, 256) + b1, ReLU
    h1 = jnp.dot(x, w1_ref[...], preferred_element_type=jnp.float32) + b1_ref[...]
    h1 = jnp.maximum(h1, 0.0)

    # Layer 2: (TB, 256) @ (256, 128) + b2, ReLU
    h2 = jnp.dot(h1.astype(jnp.bfloat16), w2_ref[...],
                 preferred_element_type=jnp.float32) + b2_ref[...]
    h2 = jnp.maximum(h2, 0.0)

    # Layer 3: (TB, 128) @ (128, 128) + b3   (logits live in first 10 lanes)
    out = jnp.dot(h2.astype(jnp.bfloat16), w3_ref[...],
                  preferred_element_type=jnp.float32) + b3_ref[...]
    o_ref[...] = out.astype(o_ref.dtype)


def attention_to_concept_mlp(x, w1, b1, w2, b2, w3, b3, *, block_b=512):
    """x: (B, 588) float32 -> (B, 10) float32 logits."""
    batch, k_in = x.shape
    h1 = w1.shape[1]
    h2 = w2.shape[1]
    n_out = w3.shape[1]

    # --- batch tiling (pad B up to a multiple of the tile) -----------------
    tb = min(block_b, _round_up(batch, 8))
    b_pad = _round_up(batch, tb)

    # --- pad / cast operands once in the wrapper ---------------------------
    x_p = jnp.zeros((b_pad, K_PAD), jnp.float32).at[:batch, :k_in].set(x)
    w1_p = jnp.zeros((K_PAD, h1), jnp.bfloat16).at[:k_in, :].set(
        w1.astype(jnp.bfloat16))
    w2_b = w2.astype(jnp.bfloat16)
    w3_p = jnp.zeros((h2, N_PAD), jnp.bfloat16).at[:, :n_out].set(
        w3.astype(jnp.bfloat16))
    b1_2d = b1.reshape(1, h1).astype(jnp.float32)
    b2_2d = b2.reshape(1, h2).astype(jnp.float32)
    b3_p = jnp.zeros((1, N_PAD), jnp.float32).at[:, :n_out].set(
        b3.reshape(1, n_out).astype(jnp.float32))

    grid = (b_pad // tb,)

    out_padded = pl.pallas_call(
        _mlp_kernel,
        out_shape=jax.ShapeDtypeStruct((b_pad, N_PAD), jnp.float32),
        grid=grid,
        in_specs=[
            pl.BlockSpec((tb, K_PAD), lambda i: (i, 0)),    # x tile (pipelined)
            pl.BlockSpec((K_PAD, h1), lambda i: (0, 0)),    # w1 (resident)
            pl.BlockSpec((1, h1), lambda i: (0, 0)),        # b1 (resident)
            pl.BlockSpec((h1, h2), lambda i: (0, 0)),       # w2 (resident)
            pl.BlockSpec((1, h2), lambda i: (0, 0)),        # b2 (resident)
            pl.BlockSpec((h2, N_PAD), lambda i: (0, 0)),    # w3 (resident)
            pl.BlockSpec((1, N_PAD), lambda i: (0, 0)),     # b3 (resident)
        ],
        out_specs=pl.BlockSpec((tb, N_PAD), lambda i: (i, 0)),
        compiler_params=pltpu.CompilerParams(
            dimension_semantics=("parallel",),
        ),
    )(x_p, w1_p, b1_2d, w2_b, b2_2d, w3_p, b3_p)

    # Strip batch padding and the zero-padded logit columns.
    return out_padded[:batch, :MLP_NUM_CONCEPTS]


# ---------------------------------------------------------------------------
# Deterministic parameter init (Xavier-uniform weights, zero biases)
# ---------------------------------------------------------------------------
def _xavier_uniform(key, fan_in, fan_out, dtype=jnp.float32):
    limit = jnp.sqrt(6.0 / (fan_in + fan_out))
    # Stored as (in, out) so the kernel computes x @ W.
    return jax.random.uniform(key, (fan_in, fan_out), dtype, minval=-limit, maxval=limit)


def init_params(key):
    k1, k2, k3 = jax.random.split(key, 3)
    w1 = _xavier_uniform(k1, MLP_INPUT_SIZE, MLP_HIDDEN_SIZE_1)
    b1 = jnp.zeros((1, MLP_HIDDEN_SIZE_1), jnp.float32)
    w2 = _xavier_uniform(k2, MLP_HIDDEN_SIZE_1, MLP_HIDDEN_SIZE_2)
    b2 = jnp.zeros((1, MLP_HIDDEN_SIZE_2), jnp.float32)
    w3 = _xavier_uniform(k3, MLP_HIDDEN_SIZE_2, MLP_NUM_CONCEPTS)
    b3 = jnp.zeros((1, MLP_NUM_CONCEPTS), jnp.float32)
    return w1, b1, w2, b2, w3, b3


# ---------------------------------------------------------------------------
# Pure-JAX reference (same bf16-input / f32-accumulate math as the kernel)
# ---------------------------------------------------------------------------
def reference_mlp(x, w1, b1, w2, b2, w3, b3):
    bf = jnp.bfloat16
    h1 = jnp.maximum(
        jnp.dot(x.astype(bf), w1.astype(bf), preferred_element_type=jnp.float32) + b1, 0.0)
    h2 = jnp.maximum(
        jnp.dot(h1.astype(bf), w2.astype(bf), preferred_element_type=jnp.float32) + b2, 0.0)
    return jnp.dot(h2.astype(bf), w3.astype(bf), preferred_element_type=jnp.float32) + b3


if __name__ == "__main__":
    key = jax.random.PRNGKey(0)
    k_x, k_params = jax.random.split(key)

    # NOTE: at batch=8 this kernel is pure launch/DMA overhead (MXU rows >95%
    # idle); in deployment, batch requests to >=256 rows per call.
    batch = 8
    x = jax.random.normal(k_x, (batch, MLP_INPUT_SIZE), jnp.float32)
    params = init_params(k_params)

    out = attention_to_concept_mlp(x, *params)
    out = jax.block_until_ready(out)

    ref = reference_mlp(x, *params)
    assert out.shape == (batch, MLP_NUM_CONCEPTS), out.shape
    assert jnp.allclose(out, ref, atol=1e-2, rtol=1e-2), "mismatch vs. reference"

    print("KERNEL_OK")
</pallas_src>

<mosaic_0001>
module attributes {stable_mosaic.version = 11 : i64} {
  func.func @_mlp_kernel(%arg0: i32, %arg1: memref<8x640xf32, #tpu.memory_space<vmem>>, %arg2: memref<640x256xbf16, #tpu.memory_space<vmem>>, %arg3: memref<1x256xf32, #tpu.memory_space<vmem>>, %arg4: memref<256x128xbf16, #tpu.memory_space<vmem>>, %arg5: memref<1x128xf32, #tpu.memory_space<vmem>>, %arg6: memref<128x128xbf16, #tpu.memory_space<vmem>>, %arg7: memref<1x128xf32, #tpu.memory_space<vmem>>, %arg8: memref<8x128xf32, #tpu.memory_space<vmem>>) attributes {dimension_semantics = [#tpu.dimension_semantics<parallel>], iteration_bounds = array<i64: 1>, scalar_prefetch = 0 : i64, scratch_operands = 0 : i64, tpu.core_type = #tpu.core_type<tc>, window_params = [{transform_indices = @transform_0, window_bounds = array<i64: 8, 640>}, {pipeline_mode = #tpu.pipeline_mode<synchronous>, transform_indices = @transform_1, window_bounds = array<i64: 640, 256>}, {pipeline_mode = #tpu.pipeline_mode<synchronous>, transform_indices = @transform_2, window_bounds = array<i64: 1, 256>}, {pipeline_mode = #tpu.pipeline_mode<synchronous>, transform_indices = @transform_3, window_bounds = array<i64: 256, 128>}, {pipeline_mode = #tpu.pipeline_mode<synchronous>, transform_indices = @transform_4, window_bounds = array<i64: 1, 128>}, {pipeline_mode = #tpu.pipeline_mode<synchronous>, transform_indices = @transform_5, window_bounds = array<i64: 128, 128>}, {pipeline_mode = #tpu.pipeline_mode<synchronous>, transform_indices = @transform_6, window_bounds = array<i64: 1, 128>}, {transform_indices = @transform_7, window_bounds = array<i64: 8, 128>}]} {
    %c0 = arith.constant 0 : index
    %c0_0 = arith.constant 0 : index
    %0 = vector.load %arg1[%c0, %c0_0] : memref<8x640xf32, #tpu.memory_space<vmem>>, vector<8x640xf32>
    %1 = arith.truncf %0 : vector<8x640xf32> to vector<8x640xbf16>
    %c0_1 = arith.constant 0 : index
    %c0_2 = arith.constant 0 : index
    %2 = vector.load %arg2[%c0_1, %c0_2] : memref<640x256xbf16, #tpu.memory_space<vmem>>, vector<640x256xbf16>
    %cst = arith.constant dense<0.000000e+00> : vector<8x256xf32>
    %3 = tpu.matmul %1, %2, %cst {dimension_numbers = #tpu.dot_dimension_numbers<[1], [0], [0], [1], [0, 0, 1, 1], [], []>} : vector<8x640xbf16>, vector<640x256xbf16>, vector<8x256xf32> -> vector<8x256xf32>
    %c0_3 = arith.constant 0 : index
    %c0_4 = arith.constant 0 : index
    %4 = vector.load %arg3[%c0_3, %c0_4] : memref<1x256xf32, #tpu.memory_space<vmem>>, vector<1x256xf32>
    %5 = vector.broadcast %4 : vector<1x256xf32> to vector<8x256xf32>
    %6 = arith.addf %3, %5 : vector<8x256xf32>
    %cst_5 = arith.constant 0.000000e+00 : f32
    %7 = vector.broadcast %cst_5 : f32 to vector<8x256xf32>
    %8 = arith.maximumf %6, %7 : vector<8x256xf32>
    %9 = arith.truncf %8 : vector<8x256xf32> to vector<8x256xbf16>
    %c0_6 = arith.constant 0 : index
    %c0_7 = arith.constant 0 : index
    %10 = vector.load %arg4[%c0_6, %c0_7] : memref<256x128xbf16, #tpu.memory_space<vmem>>, vector<256x128xbf16>
    %cst_8 = arith.constant dense<0.000000e+00> : vector<8x128xf32>
    %11 = tpu.matmul %9, %10, %cst_8 {dimension_numbers = #tpu.dot_dimension_numbers<[1], [0], [0], [1], [0, 0, 1, 1], [], []>} : vector<8x256xbf16>, vector<256x128xbf16>, vector<8x128xf32> -> vector<8x128xf32>
    %c0_9 = arith.constant 0 : index
    %c0_10 = arith.constant 0 : index
    %12 = vector.load %arg5[%c0_9, %c0_10] : memref<1x128xf32, #tpu.memory_space<vmem>>, vector<1x128xf32>
    %13 = vector.broadcast %12 : vector<1x128xf32> to vector<8x128xf32>
    %14 = arith.addf %11, %13 : vector<8x128xf32>
    %cst_11 = arith.constant 0.000000e+00 : f32
    %15 = vector.broadcast %cst_11 : f32 to vector<8x128xf32>
    %16 = arith.maximumf %14, %15 : vector<8x128xf32>
    %17 = arith.truncf %16 : vector<8x128xf32> to vector<8x128xbf16>
    %c0_12 = arith.constant 0 : index
    %c0_13 = arith.constant 0 : index
    %18 = vector.load %arg6[%c0_12, %c0_13] : memref<128x128xbf16, #tpu.memory_space<vmem>>, vector<128x128xbf16>
    %cst_14 = arith.constant dense<0.000000e+00> : vector<8x128xf32>
    %19 = tpu.matmul %17, %18, %cst_14 {dimension_numbers = #tpu.dot_dimension_numbers<[1], [0], [0], [1], [0, 0, 1, 1], [], []>} : vector<8x128xbf16>, vector<128x128xbf16>, vector<8x128xf32> -> vector<8x128xf32>
    %c0_15 = arith.constant 0 : index
    %c0_16 = arith.constant 0 : index
    %20 = vector.load %arg7[%c0_15, %c0_16] : memref<1x128xf32, #tpu.memory_space<vmem>>, vector<1x128xf32>
    %21 = vector.broadcast %20 : vector<1x128xf32> to vector<8x128xf32>
    %22 = arith.addf %19, %21 : vector<8x128xf32>
    %c0_17 = arith.constant 0 : index
    %c0_18 = arith.constant 0 : index
    %23 = vector.load %arg8[%c0_17, %c0_18] : memref<8x128xf32, #tpu.memory_space<vmem>>, vector<8x128xf32>
    tpu.vector_store %arg8[%c0_17, %c0_18], %22 {strides = array<i32>} : memref<8x128xf32, #tpu.memory_space<vmem>>, vector<8x128xf32>,
    return
  }
  func.func @transform_0(%arg0: i32) -> (i32, i32) {
    %c0_i32 = arith.constant 0 : i32
    %c0_i32_0 = arith.constant 0 : i32
    return %arg0, %c0_i32 : i32, i32
  }
  func.func @transform_1(%arg0: i32) -> (i32, i32) {
    %c0_i32 = arith.constant 0 : i32
    %c0_i32_0 = arith.constant 0 : i32
    %c0_i32_1 = arith.constant 0 : i32
    return %c0_i32, %c0_i32_0 : i32, i32
  }
  func.func @transform_2(%arg0: i32) -> (i32, i32) {
    %c0_i32 = arith.constant 0 : i32
    %c0_i32_0 = arith.constant 0 : i32
    %c0_i32_1 = arith.constant 0 : i32
    return %c0_i32, %c0_i32_0 : i32, i32
  }
  func.func @transform_3(%arg0: i32) -> (i32, i32) {
    %c0_i32 = arith.constant 0 : i32
    %c0_i32_0 = arith.constant 0 : i32
    %c0_i32_1 = arith.constant 0 : i32
    return %c0_i32, %c0_i32_0 : i32, i32
  }
  func.func @transform_4(%arg0: i32) -> (i32, i32) {
    %c0_i32 = arith.constant 0 : i32
    %c0_i32_0 = arith.constant 0 : i32
    %c0_i32_1 = arith.constant 0 : i32
    return %c0_i32, %c0_i32_0 : i32, i32
  }
  func.func @transform_5(%arg0: i32) -> (i32, i32) {
    %c0_i32 = arith.constant 0 : i32
    %c0_i32_0 = arith.constant 0 : i32
    %c0_i32_1 = arith.constant 0 : i32
    return %c0_i32, %c0_i32_0 : i32, i32
  }
  func.func @transform_6(%arg0: i32) -> (i32, i32) {
    %c0_i32 = arith.constant 0 : i32
    %c0_i32_0 = arith.constant 0 : i32
    %c0_i32_1 = arith.constant 0 : i32
    return %c0_i32, %c0_i32_0 : i32, i32
  }
  func.func @transform_7(%arg0: i32) -> (i32, i32) {
    %c0_i32 = arith.constant 0 : i32
    %c0_i32_0 = arith.constant 0 : i32
    return %arg0, %c0_i32 : i32, i32
  }
}

</mosaic_0001>

<bundles_post_ra>
// kernel: tpu_custom_call.1
= control target key start
LH: loop header
LB: loop body
LE: loop exit
PB: predicated region body
PF: predicated region fallthrough
CT: control target
= control target key end

     0   :  { %12 = vsyncpa [#allocation3], 0  ;;  %s1576_s0 = inlined_call_operand.hbm [shape: f32[8,640], index: 0, kind: input, shape index: {}]   ;;  %s1577_s1 = inlined_call_operand.hbm [shape: bf16[640,256], index: 1, kind: input, shape index: {}]   ;;  %s1578_s2 = inlined_call_operand.vmem [shape: f32[1,256], index: 2, kind: input, shape index: {}]   ;;  %s1579_s3 = inlined_call_operand.hbm [shape: bf16[256,128], index: 3, kind: input, shape index: {}]   ;;  %s1580_s4 = inlined_call_operand.vmem [shape: f32[1,128], index: 4, kind: input, shape index: {}]   ;;  %s1581_s5 = inlined_call_operand.hbm [shape: bf16[128,128], index: 5, kind: input, shape index: {}]   ;;  %s1582_s6 = inlined_call_operand.vmem [shape: f32[1,128], index: 6, kind: input, shape index: {}]   ;;  %s1583_s7 = inlined_call_operand.hbm [shape: f32[8,128], index: 7, kind: output, shape index: {}]  }
   0x1   :  { %13 = vsyncpa [#allocation6], 0 }
   0x2   :  { %14 = vsyncpa [#allocation9], 0 }
   0x3   :  { %15 = vsyncpa [#allocation4], 0  ;;  %s1455_s24 = smov [#allocation5]   ;;  %s1337_s28 = scalar_lea.hbm %s1577_s1, 10240 }
   0x4   :  { %s31_s25 = sshll.u32 %s1455_s24, 4  ;;  %p1338_p0 = scmp.ne.s32.totalorder %s1577_s1, %s1337_s28  ;;  %s32_s25 = int_to_ptr.vmem [resolvable:$true] %s31_s25 }
   0x5   :  { %p1341_p1 = scmp.lt.u32.totalorder %s1337_s28, %s1577_s1 }
   0x7   :  { %p1343_p2 = pnand %p1341_p1, %p1338_p0 }
   0x9   :  { %1346 = shalt.err (!%p1343_p2)
}
   0xa   :  { %s1347_s10 = scalar_lea.vmem %s32_s25, 10240  ;;  %p1352_p4 = scmp.lt.s32.totalorder %s32_s25, %s32_s25 }
   0xb   :  { %p1348_p3 = scmp.ne.s32.totalorder %s32_s25, %s1347_s10  ;;  %p1353_p5 = scmp.lt.s32.totalorder %s1347_s10, %s1347_s10 }
   0xd   :  { %p1354_p6 = por %p1353_p5, %p1352_p4 }
   0xf   :  { %p1355_p7 = pnand %p1354_p6, %p1348_p3 }
  0x11   :  { %1358 = shalt.err (!%p1355_p7)
}
  0x12   :  { %s1456_s11 = smov 128   ;;  %s1457_s12 = smov 8  }
  0x13   :  { %37 = dma.hbm_to_vmem [thread:$0]  %s1577_s1, 10240, %s32_s25, [#allocation6], %s1456_s11, %s1456_s11, %s1457_s12  }
  0x14   :  { %s1458_s15 = smov [#allocation2]   ;;  %s1459_s17 = smov [#allocation7]  }
  0x15   :  { %s22_s16 = sshll.u32 %s1458_s15, 4  ;;  %s45_s18 = sshll.u32 %s1459_s17, 4  ;;  %s23_s16 = int_to_ptr.vmem [resolvable:$true] %s22_s16  ;;  %s46_s18 = int_to_ptr.vmem [resolvable:$true] %s45_s18 }
  0x16   :  { %s1359_s21 = scalar_lea.hbm %s1576_s0, 640 }
  0x17   :  { %p1360_p8 = scmp.ne.s32.totalorder %s1576_s0, %s1359_s21  ;;  %p1363_p9 = scmp.lt.u32.totalorder %s1359_s21, %s1576_s0 }
  0x19   :  { %p1365_p10 = pnand %p1363_p9, %p1360_p8 }
  0x1b   :  { %1368 = shalt.err (!%p1365_p10)
}
  0x1c   :  { %s1369_s1 = scalar_lea.vmem %s23_s16, 640  ;;  %p1374_p12 = scmp.lt.s32.totalorder %s23_s16, %s23_s16 }
  0x1d   :  { %p1370_p11 = scmp.ne.s32.totalorder %s23_s16, %s1369_s1  ;;  %p1375_p13 = scmp.lt.s32.totalorder %s1369_s1, %s1369_s1 }
  0x1f   :  { %p1376_p0 = por %p1375_p13, %p1374_p12 }
  0x21   :  { %p1377_p1 = pnand %p1376_p0, %p1370_p11 }
  0x23   :  { %1380 = shalt.err (!%p1377_p1)
}
  0x24   :  { %25 = dma.hbm_to_vmem [thread:$0]  %s1576_s0, 640, %s23_s16, [#allocation3]  }
  0x25   :  { %s1381_s30 = scalar_lea.hbm %s1579_s3, 2048 }
  0x26   :  { %p1382_p2 = scmp.ne.s32.totalorder %s1579_s3, %s1381_s30  ;;  %p1385_p3 = scmp.lt.u32.totalorder %s1381_s30, %s1579_s3 }
  0x28   :  { %p1387_p4 = pnand %p1385_p3, %p1382_p2 }
  0x2a   :  { %1390 = shalt.err (!%p1387_p4)
}
  0x2b   :  { %s1391_s12 = scalar_lea.vmem %s46_s18, 2048  ;;  %p1396_p6 = scmp.lt.s32.totalorder %s46_s18, %s46_s18 }
  0x2c   :  { %p1392_p5 = scmp.ne.s32.totalorder %s46_s18, %s1391_s12  ;;  %p1397_p7 = scmp.lt.s32.totalorder %s1391_s12, %s1391_s12 }
  0x2e   :  { %p1398_p8 = por %p1397_p7, %p1396_p6 }
  0x30   :  { %p1399_p9 = pnand %p1398_p8, %p1392_p5 }
  0x32   :  { %1402 = shalt.err (!%p1399_p9)
}
  0x33   :  { %s1460_s0 = smov 64   ;;  %s1461_s13 = smov 4  }
  0x34   :  { %51 = dma.hbm_to_vmem [thread:$0]  %s1579_s3, 2048, %s46_s18, [#allocation6], %s1460_s0, %s1460_s0, %s1461_s13  }
  0x35   :  { %s1462_s16 = smov [#allocation8]   ;;  %s1403_s21 = scalar_lea.hbm %s1581_s5, 1024 }
  0x36   :  { %s59_s17 = sshll.u32 %s1462_s16, 4  ;;  %p1404_p10 = scmp.ne.s32.totalorder %s1581_s5, %s1403_s21  ;;  %s60_s17 = int_to_ptr.vmem [resolvable:$true] %s59_s17 }
  0x37   :  { %p1407_p11 = scmp.lt.u32.totalorder %s1403_s21, %s1581_s5 }
  0x39   :  { %p1409_p12 = pnand %p1407_p11, %p1404_p10 }
  0x3b   :  { %1412 = shalt.err (!%p1409_p12)
}
  0x3c   :  { %s1413_s1 = scalar_lea.vmem %s60_s17, 1024  ;;  %p1418_p0 = scmp.lt.s32.totalorder %s60_s17, %s60_s17 }
  0x3d   :  { %p1414_p13 = scmp.ne.s32.totalorder %s60_s17, %s1413_s1  ;;  %p1419_p1 = scmp.lt.s32.totalorder %s1413_s1, %s1413_s1 }
  0x3f   :  { %p1420_p2 = por %p1419_p1, %p1418_p0 }
  0x41   :  { %p1421_p3 = pnand %p1420_p2, %p1414_p13 }
  0x43   :  { %1424 = shalt.err (!%p1421_p3)
}
  0x44   :  { %65 = dma.hbm_to_vmem [thread:$0]  %s1581_s5, 1024, %s60_s17, [#allocation9], %s1460_s0, %s1460_s0, %s1461_s13  }
  0x45   :  { %1447 = dma.done.wait [#allocation3], 640  }
  0x46   :  { %1448 = vsyncadd [#allocation3], 4294966656 }
  0x47   :  { %1449 = dma.done.wait [#allocation6], 12288  }
  0x48   :  { %1450 = vsyncadd [#allocation6], 4294955008 }
  0x49   :  { %1451 = dma.done.wait [#allocation9], 1024  }
  0x4a   :  { %1452 = vsyncadd [#allocation9], 4294966272  ;;  %v1193_v0 = vld [vmem:[#allocation5 + $0x104] ss:$8 sps:$4 sm:$0xff]   ;;  %v1195_v1 = vld [vmem:[#allocation5 + $0x100] ss:$8 sps:$4 sm:$0xff]  }
  0x4b   :  { %624 = vmatprep.subr.bf16.mxu0 %v1193_v0  ;;  %v1196_v2 = vld [vmem:[#allocation5 + $0x114] ss:$8 sps:$4 sm:$0xff]   ;;  %v1198_v3 = vld [vmem:[#allocation5 + $0x110] ss:$8 sps:$4 sm:$0xff]   ;;  %v1199_v4 = vld [vmem:[#allocation5 + $0x124] ss:$8 sps:$4 sm:$0xff]  }
  0x4c   :  { %625 = vmatpush1.bf16.msra.mxu0 %v1195_v1  ;;  %v1201_v5 = vld [vmem:[#allocation5 + $0x120] ss:$8 sps:$4 sm:$0xff]   ;;  %v1202_v6 = vld [vmem:[#allocation5 + $0x134] ss:$8 sps:$4 sm:$0xff]   ;;  %v1214_v7 = vld [vmem:[#allocation5 + $0x4] ss:$8 sps:$4 sm:$0xff]  }
  0x4d   :  { %626 = vmatprep.subr.bf16.mxu0 %v1196_v2  ;;  %v1216_v8 = vld [vmem:[#allocation5] ss:$8 sps:$4 sm:$0xff]   ;;  %v1204_v9 = vld [vmem:[#allocation5 + $0x130] ss:$8 sps:$4 sm:$0xff]   ;;  %v1205_v10 = vld [vmem:[#allocation5 + $0x144] ss:$8 sps:$4 sm:$0xff]   ;;  %583 = vmatprep.subr.bf16.mxu1 %v1214_v7 }
  0x4e   :  { %v1220_v11 = vld [vmem:[#allocation5 + $0x14] ss:$8 sps:$4 sm:$0xff]   ;;  %584 = vmatpush1.bf16.msra.mxu1 %v1216_v8  ;;  %v1222_v12 = vld [vmem:[#allocation5 + $0x10] ss:$8 sps:$4 sm:$0xff]   ;;  %v1207_v13 = vld [vmem:[#allocation5 + $0x140] ss:$8 sps:$4 sm:$0xff]  }
  0x4f   :  { %585 = vmatprep.subr.bf16.mxu1 %v1220_v11  ;;  %v1226_v14 = vld [vmem:[#allocation5 + $0x24] ss:$8 sps:$4 sm:$0xff]   ;;  %v1208_v15 = vld [vmem:[#allocation5 + $0x154] ss:$8 sps:$4 sm:$0xff]   ;;  %v1228_v16 = vld [vmem:[#allocation5 + $0x20] ss:$8 sps:$4 sm:$0xff]  }
  0x50   :  { %627 = vmatpush1.bf16.msra.mxu0 %v1198_v3  ;;  %v1232_v17 = vld [vmem:[#allocation5 + $0x34] ss:$8 sps:$4 sm:$0xff]   ;;  %v1210_v18 = vld [vmem:[#allocation5 + $0x150] ss:$8 sps:$4 sm:$0xff]   ;;  %v1211_v19 = vld [vmem:[#allocation5 + $0x164] ss:$8 sps:$4 sm:$0xff]  }
  0x51   :  { %628 = vmatprep.subr.bf16.mxu0 %v1199_v4  ;;  %v1234_v20 = vld [vmem:[#allocation5 + $0x30] ss:$8 sps:$4 sm:$0xff]   ;;  %v1238_v21 = vld [vmem:[#allocation5 + $0x44] ss:$8 sps:$4 sm:$0xff]   ;;  %v1213_v22 = vld [vmem:[#allocation5 + $0x160] ss:$8 sps:$4 sm:$0xff]  }
  0x52   :  { %586 = vmatpush1.bf16.msra.mxu1 %v1222_v12  ;;  %v1217_v23 = vld [vmem:[#allocation5 + $0x174] ss:$8 sps:$4 sm:$0xff]   ;;  %v1240_v24 = vld [vmem:[#allocation5 + $0x40] ss:$8 sps:$4 sm:$0xff]   ;;  %v1219_v26 = vld [vmem:[#allocation5 + $0x170] ss:$8 sps:$4 sm:$0xff]  }
  0x53   :  { %587 = vmatprep.subr.bf16.mxu1 %v1226_v14  ;;  %v1244_v25 = vld [vmem:[#allocation5 + $0x54] ss:$8 sps:$4 sm:$0xff]   ;;  %v1223_v27 = vld [vmem:[#allocation5 + $0x184] ss:$8 sps:$4 sm:$0xff]   ;;  %v1246_v28 = vld [vmem:[#allocation5 + $0x50] ss:$8 sps:$4 sm:$0xff]  }
  0x54   :  { %629 = vmatpush1.bf16.msra.mxu0 %v1201_v5  ;;  %v1250_v29 = vld [vmem:[#allocation5 + $0x64] ss:$8 sps:$4 sm:$0xff]   ;;  %v1225_v30 = vld [vmem:[#allocation5 + $0x180] ss:$8 sps:$4 sm:$0xff]   ;;  %v1229_v31 = vld [vmem:[#allocation5 + $0x194] ss:$8 sps:$4 sm:$0xff]  }
  0x55   :  { %630 = vmatprep.subr.bf16.mxu0 %v1202_v6  ;;  %v1252_v32 = vld [vmem:[#allocation5 + $0x60] ss:$8 sps:$4 sm:$0xff]   ;;  %v1256_v33 = vld [vmem:[#allocation5 + $0x74] ss:$8 sps:$4 sm:$0xff]   ;;  %v1231_v35 = vld [vmem:[#allocation5 + $0x190] ss:$8 sps:$4 sm:$0xff]  }
  0x56   :  { %588 = vmatpush1.bf16.msra.mxu1 %v1228_v16  ;;  %v84_v34 = vld [vmem:[#allocation2 + $0x18] sm:$0xff]  ;;  %v1235_v37 = vld [vmem:[#allocation5 + $0x1a4] ss:$8 sps:$4 sm:$0xff]   ;;  %v1237_v40 = vld [vmem:[#allocation5 + $0x1a0] ss:$8 sps:$4 sm:$0xff]   ;;  %v1463_v12 = vmov 0  }
  0x57   :  { %589 = vmatprep.subr.bf16.mxu1 %v1232_v17  ;;  %v89_v36 = vpack.c.bf16 %v84_v34, %v84_v34  ;;  %v1258_v38 = vld [vmem:[#allocation5 + $0x70] ss:$8 sps:$4 sm:$0xff]   ;;  %v1262_v39 = vld [vmem:[#allocation5 + $0x84] ss:$8 sps:$4 sm:$0xff]   ;;  %v1241_v41 = vld [vmem:[#allocation5 + $0x1b4] ss:$8 sps:$4 sm:$0xff]  }
  0x58   :  { %631 = vmatpush1.bf16.msra.mxu0 %v1204_v9  ;;  %v1264_v42 = vld [vmem:[#allocation5 + $0x80] ss:$8 sps:$4 sm:$0xff]   ;;  %v1268_v43 = vld [vmem:[#allocation5 + $0x94] ss:$8 sps:$4 sm:$0xff]   ;;  %v1243_v44 = vld [vmem:[#allocation5 + $0x1b0] ss:$8 sps:$4 sm:$0xff]  }
  0x59   :  { %632 = vmatprep.subr.bf16.mxu0 %v1205_v10  ;;  %656 = vmatprep.mubr.bf16.mxu0 %v89_v36  ;;  %v1247_v45 = vld [vmem:[#allocation5 + $0x1c4] ss:$8 sps:$4 sm:$0xff]   ;;  %v1270_v46 = vld [vmem:[#allocation5 + $0x90] ss:$8 sps:$4 sm:$0xff]   ;;  %v1249_v48 = vld [vmem:[#allocation5 + $0x1c0] ss:$8 sps:$4 sm:$0xff]  }
  0x5a   :  { %590 = vmatpush1.bf16.msra.mxu1 %v1234_v20  ;;  %v1274_v47 = vld [vmem:[#allocation5 + $0xa4] ss:$8 sps:$4 sm:$0xff]   ;;  %v1253_v49 = vld [vmem:[#allocation5 + $0x1d4] ss:$8 sps:$4 sm:$0xff]   ;;  %v1276_v50 = vld [vmem:[#allocation5 + $0xa0] ss:$8 sps:$4 sm:$0xff]  }
  0x5b   :  { %591 = vmatprep.subr.bf16.mxu1 %v1238_v21  ;;  %v1280_v51 = vld [vmem:[#allocation5 + $0xb4] ss:$8 sps:$4 sm:$0xff]   ;;  %v1255_v52 = vld [vmem:[#allocation5 + $0x1d0] ss:$8 sps:$4 sm:$0xff]   ;;  %v1259_v53 = vld [vmem:[#allocation5 + $0x1e4] ss:$8 sps:$4 sm:$0xff]  }
  0x5c   :  { %633 = vmatpush1.bf16.msra.mxu0 %v1207_v13  ;;  %v82_v54 = vld [vmem:[#allocation2 + $0x8] sm:$0xff]  ;;  %v1282_v55 = vld [vmem:[#allocation5 + $0xb0] ss:$8 sps:$4 sm:$0xff]   ;;  %v1265_v59 = vld [vmem:[#allocation5 + $0x1f4] ss:$8 sps:$4 sm:$0xff]   ;;  %vm1465_vm0 = vmmov 0  }
  0x5d   :  { %634 = vmatprep.subr.bf16.mxu0 %v1208_v15  ;;  %v87_v56 = vpack.c.bf16 %v82_v54, %v82_v54  ;;  %v1286_v57 = vld [vmem:[#allocation5 + $0xc4] ss:$8 sps:$4 sm:$0xff]   ;;  %v1261_v58 = vld [vmem:[#allocation5 + $0x1e0] ss:$8 sps:$4 sm:$0xff]   ;;  %v1267_v60 = vld [vmem:[#allocation5 + $0x1f0] ss:$8 sps:$4 sm:$0xff]  }
  0x5e   :  { %592 = vmatpush1.bf16.msra.mxu1 %v1240_v24  ;;  %v1288_v61 = vld [vmem:[#allocation5 + $0xc0] ss:$8 sps:$4 sm:$0xff]   ;;  %v1292_v62 = vld [vmem:[#allocation5 + $0xd4] ss:$8 sps:$4 sm:$0xff]   ;;  %v1273_v0 = vld [vmem:[#allocation5 + $0x204] ss:$8 sps:$4 sm:$0xff]  }
  0x5f   :  { %593 = vmatprep.subr.bf16.mxu1 %v1244_v25  ;;  %615 = vmatprep.mubr.bf16.mxu1 %v87_v56  ;;  %v83_v63 = vld [vmem:[#allocation2 + $0x10] sm:$0xff]  ;;  %v1294_v2 = vld [vmem:[#allocation5 + $0xd0] ss:$8 sps:$4 sm:$0xff]   ;;  %v1279_v5 = vld [vmem:[#allocation5 + $0x214] ss:$8 sps:$4 sm:$0xff]   ;;  %s1466_s30 = smov [#allocation10]  }
  0x60   :  { %635 = vmatpush1.bf16.msra.mxu0 %v1210_v18  ;;  %v1271_v1 = vld [vmem:[#allocation5 + $0x200] ss:$8 sps:$4 sm:$0xff]   ;;  %v88_v3 = vpack.c.bf16 %v83_v63, %v83_v63  ;;  %v1298_v4 = vld [vmem:[#allocation5 + $0xe4] ss:$8 sps:$4 sm:$0xff]   ;;  %v1277_v7 = vld [vmem:[#allocation5 + $0x210] ss:$8 sps:$4 sm:$0xff]  }
  0x61   :  { %636 = vmatprep.subr.bf16.mxu0 %v1211_v19  ;;  %v1300_v6 = vld [vmem:[#allocation5 + $0xe0] ss:$8 sps:$4 sm:$0xff]   ;;  %v1304_v8 = vld [vmem:[#allocation5 + $0xf4] ss:$8 sps:$4 sm:$0xff]   ;;  %v1285_v9 = vld [vmem:[#allocation5 + $0x224] ss:$8 sps:$4 sm:$0xff]  }
  0x62   :  { %594 = vmatpush1.bf16.msra.mxu1 %v1246_v28  ;;  %v1306_v10 = vld [vmem:[#allocation5 + $0xf0] ss:$8 sps:$4 sm:$0xff]   ;;  %v1313_v13 = vld [vmem:[#allocation7 + $0x40] sm:$0xff]   ;;  %v1291_v15 = vld [vmem:[#allocation5 + $0x234] ss:$8 sps:$4 sm:$0xff]   ;;  %s1005_s8 = sshll.u32 %s1466_s30, 4  ;;  %s1006_s8 = int_to_ptr.vmem [resolvable:$true] %s1005_s8 }
  0x63   :  { %595 = vmatprep.subr.bf16.mxu1 %v1250_v29  ;;  %v81_v11 = vld [vmem:[#allocation2] sm:$0xff]  ;;  %v1283_v14 = vld [vmem:[#allocation5 + $0x220] ss:$8 sps:$4 sm:$0xff]   ;;  %v1297_v20 = vld [vmem:[#allocation5 + $0x244] ss:$8 sps:$4 sm:$0xff]   ;;  %p1430_p5 = scmp.lt.s32.totalorder %s1006_s8, %s1006_s8 }
  0x64   :  { %637 = vmatpush1.bf16.msra.mxu0 %v1213_v22  ;;  %v1314_v16 = vld [vmem:[#allocation7] sm:$0xff]   ;;  %v86_v17 = vpack.c.bf16 %v81_v11, %v81_v11  ;;  %v1315_v18 = vld [vmem:[#allocation7 + $0x48] sm:$0xff]   ;;  %v1289_v19 = vld [vmem:[#allocation5 + $0x230] ss:$8 sps:$4 sm:$0xff]  }
  0x65   :  { %638 = vmatprep.subr.bf16.mxu0 %v1217_v23  ;;  %v1316_v21 = vld [vmem:[#allocation7 + $0x8] sm:$0xff]   ;;  %v1317_v22 = vld [vmem:[#allocation7 + $0x50] sm:$0xff]   ;;  %v1320_v29 = vld [vmem:[#allocation7 + $0x18] sm:$0xff]  }
  0x66   :  { %596 = vmatpush1.bf16.msra.mxu1 %v1252_v32  ;;  %v1295_v23 = vld [vmem:[#allocation5 + $0x240] ss:$8 sps:$4 sm:$0xff]   ;;  %v1303_v24 = vld [vmem:[#allocation5 + $0x254] ss:$8 sps:$4 sm:$0xff]   ;;  %v1309_v28 = vld [vmem:[#allocation5 + $0x264] ss:$8 sps:$4 sm:$0xff]  }
  0x67   :  { %597 = vmatprep.subr.bf16.mxu1 %v1256_v33  ;;  %v1318_v25 = vld [vmem:[#allocation7 + $0x10] sm:$0xff]   ;;  %v1322_v33 = vld [vmem:[#allocation7 + $0x20] sm:$0xff]  }
  0x68   :  { %639 = vmatpush1.bf16.msra.mxu0 %v1219_v26  ;;  %v1319_v26 = vld [vmem:[#allocation7 + $0x58] sm:$0xff]  }
  0x69   :  { %640 = vmatprep.subr.bf16.mxu0 %v1223_v27  ;;  %v1301_v27 = vld [vmem:[#allocation5 + $0x250] ss:$8 sps:$4 sm:$0xff]   ;;  %v1312_v32 = vld [vmem:[#allocation5 + $0x274] ss:$8 sps:$4 sm:$0xff]  }
  0x6a   :  { %598 = vmatpush1.bf16.msra.mxu1 %v1258_v38  ;;  %v1310_v34 = vld [vmem:[#allocation5 + $0x270] ss:$8 sps:$4 sm:$0xff]   ;;  %v1324_v38 = vld [vmem:[#allocation7 + $0x28] sm:$0xff]  }
  0x6b   :  { %599 = vmatprep.subr.bf16.mxu1 %v1262_v39  ;;  %v1325_v39 = vld [vmem:[#allocation7 + $0x70] sm:$0xff]  }
  0x6c   :  { %641 = vmatpush1.bf16.msra.mxu0 %v1225_v30  ;;  %v1321_v30 = vld [vmem:[#allocation7 + $0x60] sm:$0xff]  }
  0x6d   :  { %642 = vmatprep.subr.bf16.mxu0 %v1229_v31  ;;  %v1307_v31 = vld [vmem:[#allocation5 + $0x260] ss:$8 sps:$4 sm:$0xff]  }
  0x6e   :  { %600 = vmatpush1.bf16.msra.mxu1 %v1264_v42  ;;  %v1328_v42 = vld [vmem:[#allocation7 + $0x38] sm:$0xff]  }
  0x6f   :  { %601 = vmatprep.subr.bf16.mxu1 %v1268_v43  ;;  %v1464_v43 = vmov 0.0  }
  0x70   :  { %643 = vmatpush1.bf16.msra.mxu0 %v1231_v35  ;;  %v85_v35 = vld [vmem:[#allocation2 + $0x20] sm:$0xff] }
  0x71   :  { %644 = vmatprep.subr.bf16.mxu0 %v1235_v37  ;;  %v90_v36 = vpack.c.bf16 %v85_v35, %v85_v35  ;;  %v1323_v37 = vld [vmem:[#allocation7 + $0x68] sm:$0xff]  }
  0x72   :  { %602 = vmatpush1.bf16.msra.mxu1 %v1270_v46 }
  0x73   :  { %603 = vmatprep.subr.bf16.mxu1 %v1274_v47  ;;  %v173_v47 = vlaneseq }
  0x74   :  { %645 = vmatpush1.bf16.msra.mxu0 %v1237_v40  ;;  %v1326_v40 = vld [vmem:[#allocation7 + $0x30] sm:$0xff]  }
  0x75   :  { %646 = vmatprep.subr.bf16.mxu0 %v1241_v41  ;;  %v1327_v41 = vld [vmem:[#allocation7 + $0x78] sm:$0xff]  }
  0x76   :  { %604 = vmatpush1.bf16.msra.mxu1 %v1276_v50 }
  0x77   :  { %605 = vmatprep.subr.bf16.mxu1 %v1280_v51  ;;  %v171_v51 = vld [vmem:[%s1578_s2] sm:$0x3] }
  0x78   :  { %647 = vmatpush1.bf16.msra.mxu0 %v1243_v44 }
  0x79   :  { %648 = vmatprep.subr.bf16.mxu0 %v1247_v45 }
  0x7a   :  { %606 = vmatpush1.bf16.msra.mxu1 %v1282_v55 }
  0x7b   :  { %607 = vmatprep.subr.bf16.mxu1 %v1286_v57 }
  0x7c   :  { %649 = vmatpush1.bf16.msra.mxu0 %v1249_v48 }
  0x7d   :  { %650 = vmatprep.subr.bf16.mxu0 %v1253_v49  ;;  %v174_v49 = vshrl.u32 %v173_v47, 7 }
  0x7e   :  { %608 = vmatpush1.bf16.msra.mxu1 %v1288_v61 }
  0x7f   :  { %609 = vmatprep.subr.bf16.mxu1 %v1292_v62  ;;  %v175_v50 = vsub.s32 0, %v174_v49 }
  0x80   :  { %651 = vmatpush1.bf16.msra.mxu0 %v1255_v52  ;;  %v179_v52 = vsub.s32 1, %v174_v49 }
  0x81   :  { %652 = vmatprep.subr.bf16.mxu0 %v1259_v53  ;;  %v176_v53 = vrot.slane %v171_v51, %v175_v50 }
  0x82   :  { %610 = vmatpush1.bf16.msra.mxu1 %v1294_v2  ;;  %v180_v54 = vrot.slane %v171_v51, %v179_v52  ;;  %v1329_v2 = vld [vmem:[#allocation8] sm:$0xff]  }
  0x83   :  { %611 = vmatprep.subr.bf16.mxu1 %v1298_v4  ;;  %v1330_v4 = vld [vmem:[#allocation8 + $0x8] sm:$0xff]  }
  0x84   :  { %653 = vmatpush1.bf16.msra.mxu0 %v1261_v58 }
  0x85   :  { %654 = vmatprep.subr.bf16.mxu0 %v1265_v59 }
  0x86   :  { %612 = vmatpush1.bf16.msra.mxu1 %v1300_v6  ;;  %v1332_v6 = vld [vmem:[#allocation8 + $0x18] sm:$0xff]  }
  0x87   :  { %613 = vmatprep.subr.bf16.mxu1 %v1304_v8  ;;  %v1334_v8 = vld [vmem:[#allocation8 + $0x28] sm:$0xff]  }
  0x88   :  { %655 = vmatpush1.bf16.msra.mxu0 %v1267_v60 }
  0x89   :  { %665 = vmatprep.subr.bf16.mxu0 %v1273_v0 }
  0x8a   :  { %614 = vmatpush1.bf16.msra.mxu1 %v1306_v10  ;;  %v1336_v10 = vld [vmem:[#allocation8 + $0x38] sm:$0xff]  }
  0x8b   :  { %657 = vmatmul.mubr.bf16.vlgmr.msra.gmra.mrb[0].mxu0 %v88_v3  ;;  %1122 = vmatprep.subr.bf16.mxu1 %v1313_v13 }
  0x8c   :  { %666 = vmatpush1.bf16.msra.mxu0 %v1271_v1  ;;  %697 = vmatprep.mubr.bf16.mxu0 %v1463_v12  ;;  %v1096_v12 = vld [vmem:[%s1580_s4] ss:$0 sm:$0xff]  ;;  %s1425_s4 = scalar_lea.vmem %s1006_s8, 128 }
  0x8d   :  { %667 = vmatprep.subr.bf16.mxu0 %v1279_v5  ;;  %616 = vmatmul.mubr.bf16.vlgmr.msra.gmra.mrb[0].mxu1 %v86_v17  ;;  %v1331_v5 = vld [vmem:[#allocation8 + $0x10] sm:$0xff]   ;;  %p1426_p4 = scmp.ne.s32.totalorder %s1006_s8, %s1425_s4  ;;  %p1431_p6 = scmp.lt.s32.totalorder %s1425_s4, %s1425_s4 }
  0x8e   :  { %1123 = vmatpush3.bf16.msra.mxu1 %v1314_v16 }
  0x8f   :  { %1124 = vmatprep.subr.bf16.mxu1 %v1315_v18  ;;  %p1432_p7 = por %p1431_p6, %p1430_p5 }
  0x90   :  { %668 = vmatpush1.bf16.msra.mxu0 %v1277_v7  ;;  %v1333_v7 = vld [vmem:[#allocation8 + $0x20] sm:$0xff]  }
  0x91   :  { %669 = vmatprep.subr.bf16.mxu0 %v1285_v9  ;;  %v1335_v9 = vld [vmem:[#allocation8 + $0x30] sm:$0xff]   ;;  %p1433_p8 = pnand %p1432_p7, %p1426_p4 }
  0x92   :  { %1125 = vmatpush3.bf16.msra.mxu1 %v1316_v21 }
  0x93   :  { %1126 = vmatprep.subr.bf16.mxu1 %v1317_v22 }
  0x94   :  { %670 = vmatpush1.bf16.msra.mxu0 %v1283_v14 }
  0x95   :  { %671 = vmatprep.subr.bf16.mxu0 %v1291_v15 }
  0x96   :  { %1127 = vmatpush3.bf16.msra.mxu1 %v1318_v25 }
  0x97   :  { %1128 = vmatprep.subr.bf16.mxu1 %v1319_v26 }
  0x98   :  { %672 = vmatpush1.bf16.msra.mxu0 %v1289_v19 }
  0x99   :  { %673 = vmatprep.subr.bf16.mxu0 %v1297_v20  ;;  %v1113_v20 = vld [vmem:[%s1582_s6] ss:$0 sm:$0xff] }
  0x9a   :  { %1129 = vmatpush3.bf16.msra.mxu1 %v1320_v29 }
  0x9b   :  { %1130 = vmatprep.subr.bf16.mxu1 %v1321_v30 }
  0x9c   :  { %674 = vmatpush1.bf16.msra.mxu0 %v1295_v23 }
  0x9d   :  { %675 = vmatprep.subr.bf16.mxu0 %v1303_v24 }
  0x9e   :  { %1131 = vmatpush3.bf16.msra.mxu1 %v1322_v33 }
  0x9f   :  { %1132 = vmatprep.subr.bf16.mxu1 %v1323_v37 }
  0xa0   :  { %676 = vmatpush1.bf16.msra.mxu0 %v1301_v27 }
  0xa1   :  { %677 = vmatprep.subr.bf16.mxu0 %v1309_v28 }
  0xa2   :  { %1133 = vmatpush3.bf16.msra.mxu1 %v1324_v38 }
  0xa3   :  { %1134 = vmatprep.subr.bf16.mxu1 %v1325_v39 }
  0xa4   :  { %678 = vmatpush1.bf16.msra.mxu0 %v1307_v31 }
  0xa5   :  { %679 = vmatprep.subr.bf16.mxu0 %v1312_v32 }
  0xa6   :  { %1135 = vmatpush3.bf16.msra.mxu1 %v1326_v40 }
  0xa7   :  { %1136 = vmatprep.subr.bf16.mxu1 %v1327_v41 }
  0xa8   :  { %680 = vmatpush1.bf16.msra.mxu0 %v1310_v34 }
  0xaa   :  { %1137 = vmatpush3.bf16.msra.mxu1 %v1328_v42 }
  0xab   :  { %698 = vmatmul.mubr.bf16.vlgmr.msra.gmra.mrb[0].mxu0 %v90_v36  ;;  %1153 = vmatprep.subr.bf16.mxu1 %v1464_v43 }
 0x160   :  { %v617_v44 = vpop.f32.mrb[0].mxu1 }
 0x161   :  { %v619_v45 = vpop.f32.mrb[1].mxu1  ;;  %v618_v55 = vadd.f32 %v617_v44, %v176_v53 }
 0x162   :  { %v621_v46 = vpop.f32.mrb[2].mxu1  ;;  %v620_v56 = vadd.f32 %v619_v45, %v180_v54 }
 0x163   :  { %v622_v48 = vpop.f32.mrb[3].mxu1 }
 0x17e   :  { %v699_v57 = vpop.f32.mrb[0].mxu0 }
 0x17f   :  { %v1174_v58 = vadd.f32 %v699_v57, %v618_v55  ;;  %v701_v59 = vpop.f32.mrb[1].mxu0 }
 0x180   :  { %v1176_v60 = vadd.f32 %v701_v59, %v620_v56  ;;  %v703_v61 = vpop.f32.mrb[2].mxu0 }
 0x181   :  { %v706_v62 = vmax.f32 %v1174_v58, 0.0  ;;  %v704_v63 = vpop.f32.mrb[3].mxu0 }
 0x182   :  { %v707_v0 = vmax.f32 %v1176_v60, 0.0 }
 0x183   :  { %v708_v3 = vpack.c.bf16 %v706_v62, %v706_v62 }
 0x184   :  { %v709_v1 = vpack.c.bf16 %v707_v0, %v707_v0 }
 0x186   :  { %877 = vmatprep.mubr.bf16.mxu1 %v709_v1 }
 0x187   :  { %878 = vmatmul.mubr.bf16.vlgmr.msra.gmra.mrb[4].mxu1 %v708_v3 }
 0x188   :  { %1154 = vmatpush3.bf16.msra.mxu1 %v1329_v2  ;;  %1169 = vmatprep.mubr.msk.bf16.mxu1 %vm1465_vm0, %v1464_v43 }
 0x189   :  { %1155 = vmatprep.subr.bf16.mxu1 %v1464_v43 }
 0x18c   :  { %1156 = vmatpush3.bf16.msra.mxu1 %v1330_v4 }
 0x18d   :  { %1157 = vmatprep.subr.bf16.mxu1 %v1464_v43 }
 0x190   :  { %1158 = vmatpush3.bf16.msra.mxu1 %v1331_v5 }
 0x191   :  { %1159 = vmatprep.subr.bf16.mxu1 %v1464_v43 }
 0x194   :  { %1160 = vmatpush3.bf16.msra.mxu1 %v1332_v6 }
 0x195   :  { %1161 = vmatprep.subr.bf16.mxu1 %v1464_v43 }
 0x198   :  { %1162 = vmatpush3.bf16.msra.mxu1 %v1333_v7 }
 0x199   :  { %1163 = vmatprep.subr.bf16.mxu1 %v1464_v43 }
 0x19c   :  { %1164 = vmatpush3.bf16.msra.mxu1 %v1334_v8 }
 0x19d   :  { %1165 = vmatprep.subr.bf16.mxu1 %v1464_v43 }
 0x1a0   :  { %1166 = vmatpush3.bf16.msra.mxu1 %v1335_v9 }
 0x1a1   :  { %1167 = vmatprep.subr.bf16.mxu1 %v1464_v43 }
 0x1a4   :  { %1168 = vmatpush3.bf16.msra.mxu1 %v1336_v10 }
 0x25a   :  { %v1138_v11 = vpop.f32.mrb[4].mxu1 }
 0x25b   :  { %v1139_v13 = vpop.f32.mrb[5].mxu1 }
 0x25c   :  { %v1140_v14 = vadd.f32 %v1139_v13, %v1138_v11  ;;  %v1141_v15 = vpop.f32.mrb[6].mxu1 }
 0x25d   :  { %v1142_v16 = vpop.f32.mrb[7].mxu1 }
 0x25e   :  { %v880_v17 = vadd.f32 %v1140_v14, %v1096_v12 }
 0x260   :  { %v885_v18 = vmax.f32 %v880_v17, 0.0 }
 0x262   :  { %v886_v19 = vpack.c.bf16 %v885_v18, %v885_v18 }
 0x264   :  { %1170 = vmatmul.mubr.bf16.vlgmr.msra.gmra.mrb[8].mxu1 %v886_v19 }
 0x337   :  { %v992_v21 = vpop.f32.mrb[8].mxu1 }
 0x338   :  { %v993_v22 = vadd.f32 %v1113_v20, %v992_v21  ;;  %v1171_v23 = vpop.f32.mrb[9].mxu1 }
 0x339   :  { %v995_v24 = vpop.f32.mrb[10].mxu1 }
 0x33a   :  { %998 = vst [vmem:[#allocation10] sm:$0xff] %v993_v22  ;;  %v1172_v25 = vpop.f32.mrb[11].mxu1 }
 0x33b   :  { %1436 = shalt.err (!%p1433_p8)
}
 0x33c   :  { %s1437_s6 = scalar_lea.hbm %s1583_s7, 128 }
 0x33d   :  { %p1438_p9 = scmp.ne.s32.totalorder %s1583_s7, %s1437_s6  ;;  %p1441_p10 = scmp.lt.u32.totalorder %s1437_s6, %s1583_s7 }
 0x33f   :  { %p1443_p11 = pnand %p1441_p10, %p1438_p9 }
 0x341   :  { %1446 = shalt.err (!%p1443_p11)
}
 0x342   :  { %1008 = dma.vmem_to_hbm [thread:$0]  %s1006_s8, 128, %s1583_s7, [#allocation4]  }
 0x343   :  { %1453 = dma.done.wait [#allocation4], 128  }
 0x344   :  { %1454 = vsyncadd [#allocation4], 4294967168 }
 0x345   :  { %1012 = vsyncpa [#allocation3], 1 }
 0x346   :  { %1013 = vsyncpa [#allocation6], 1 }
 0x347   :  { %1014 = vsyncpa [#allocation9], 1 }
 0x348   :  { %1015 = vsyncpa [#allocation4], 1 }

</bundles_post_ra>
